<compile_context>
chip_gen: v7x
topology: tpu7x:2x2x1
jax: 0.10.0
libtpu: 0.0.40
codegen_flags: <defaults>
</compile_context>

<pallas_src>
import functools

import jax
import jax.numpy as jnp
from jax import lax
from jax.experimental import pallas as pl
from jax.experimental.pallas import tpu as pltpu

EPS = 1e-5  # torch.nn.BatchNorm2d default eps
_MIB = 1024 * 1024


def _vmem_capacity_bytes():
    """Physical VMEM of the local TPU generation (conservative fallback)."""
    try:
        return int(pltpu.get_tpu_info().vmem_capacity_bytes)
    except Exception:
        return 64 * _MIB  # v7x is the smallest -> safe everywhere


def _spatial_tile_candidates(HW):
    if HW <= 128:
        return [HW]  # single full-extent block (no lane-alignment needed)
    return [ts for ts in (2048, 1024, 512, 256, 128) if ts <= HW]


def _select_tiles(B_pad, C, HW, x_itemsize, x_budget_bytes):
    """Jointly pick (batch_tile, spatial_tile).

    Prioritize the spatial tile (it sets the HBM DMA segment length -> roofline
    fraction) and shrink the batch tile for large C, never the other way round.
    """
    ts_cands = _spatial_tile_candidates(HW)

    if B_pad < 8:
        bt_cands = [B_pad]                      # full-extent batch block
    else:
        bt_cands = [bt for bt in (64, 32, 16, 8)
                    if bt <= B_pad and B_pad % bt == 0]
        if B_pad >= 16:
            # Keep >= 2 batch programs so the "parallel" axis can feed both
            # TensorCores on v7x (no-op perf-wise on 1-TC parts).
            cap = max(8, ((B_pad // 2) // 8) * 8)
            bt_cands = [bt for bt in bt_cands if bt <= cap] or [8]
        if not bt_cands:
            bt_cands = [8]

    def fits(bt, ts):
        return 2 * bt * C * ts * x_itemsize <= x_budget_bytes

    # 1) largest bt that still allows a "long enough" spatial tile (>=512, or
    #    the largest candidate when HW itself is small).
    ts_target = ts_cands[0] if ts_cands[0] < 512 else 512
    bt = None
    for cand in bt_cands:
        if fits(cand, ts_target):
            bt = cand
            break
    if bt is None:
        bt = bt_cands[-1]                       # smallest bt; ts shrinks below
    # 2) largest spatial tile that fits with that bt (floor: smallest candidate).
    ts = ts_cands[-1]
    for cand in ts_cands:
        if fits(bt, cand):
            ts = cand
            break
    return bt, ts


def _gp_bn_fc_bn_kernel(x_ref, w_ref, s1_ref, o1_ref, s2_ref, o2_ref,
                        out_ref, acc_ref, *, hw, ts, needs_mask):
    # x_ref : (bt, C, ts) slab of the flattened input (native dtype)
    # w_ref : (C, E) fc weight        s1/o1 : (1, C) folded bn1 scale/offset
    # out_ref: (bt, E)                s2/o2 : (1, E) folded bn2 scale/offset
    # acc_ref: (bt, C) float32 VMEM scratch (per-channel running sum)
    k = pl.program_id(1)
    last = pl.num_programs(1) - 1

    @pl.when(k == 0)
    def _init():
        acc_ref[...] = jnp.zeros_like(acc_ref)

    tile = x_ref[...].astype(jnp.float32)                  # upcast in-kernel

    if needs_mask:  # static Python branch; mask only the (ragged) last step
        @pl.when(k == last)
        def _masked_accum():
            idx = k * ts + lax.broadcasted_iota(jnp.int32, tile.shape, 2)
            acc_ref[...] += jnp.sum(jnp.where(idx < hw, tile, 0.0), axis=-1)

        @pl.when(k != last)
        def _accum():
            acc_ref[...] += jnp.sum(tile, axis=-1)
    else:
        acc_ref[...] += jnp.sum(tile, axis=-1)

    @pl.when(k == last)
    def _finalize():
        pooled = acc_ref[...] * (1.0 / hw)                 # global average pool
        h = pooled * s1_ref[...] + o1_ref[...]             # bn1 (eval, folded)
        y = jnp.dot(h.astype(w_ref.dtype), w_ref[...],     # 1x1 conv == matmul
                    preferred_element_type=jnp.float32)
        out_ref[...] = (y * s2_ref[...] + o2_ref[...]).astype(out_ref.dtype)


def gp_bn_fc_bn(x_nchw, w_fc, g1, b1, rm1, rv1, g2, b2, rm2, rv2, eps=EPS):
    B, C, H, W = x_nchw.shape
    E = w_fc.shape[0]
    HW = H * W

    x3 = x_nchw.reshape(B, C, HW)                # keep native dtype (no wrapper upcast)

    # Pad batch to a multiple of 8 so block sublane extents stay bounded
    # (padded rows are discarded from the output).
    if B >= 8 and B % 8 != 0:
        B_pad = ((B + 7) // 8) * 8
        x3 = jnp.pad(x3, ((0, B_pad - B), (0, 0), (0, 0)))
    else:
        B_pad = B

    # Resident weight: bf16 for low-precision inputs (halves the double-buffered
    # weight footprint, MXU-native); f32 otherwise to preserve f32 accuracy.
    w_dtype = (jnp.bfloat16 if x_nchw.dtype in (jnp.bfloat16, jnp.float16)
               else jnp.float32)
    w_t = w_fc.reshape(E, C).T.astype(w_dtype)   # (C, E)

    # Fold eval-mode BatchNorm into per-channel scale/offset (tiny vectors).
    f32 = jnp.float32
    scale1 = g1.reshape(-1).astype(f32) * lax.rsqrt(rv1.reshape(-1).astype(f32) + eps)
    off1 = b1.reshape(-1).astype(f32) - rm1.reshape(-1).astype(f32) * scale1
    scale2 = g2.reshape(-1).astype(f32) * lax.rsqrt(rv2.reshape(-1).astype(f32) + eps)
    off2 = b2.reshape(-1).astype(f32) - rm2.reshape(-1).astype(f32) * scale2
    s1, o1 = scale1.reshape(1, C), off1.reshape(1, C)
    s2, o2 = scale2.reshape(1, E), off2.reshape(1, E)

    # ---- generation-aware VMEM budgeting --------------------------------
    vmem_cap = _vmem_capacity_bytes()
    # Scoped limit: ~48 MiB on 64 MiB parts (v7x), ~96 MiB on 128 MiB parts.
    vmem_limit = max(32 * _MIB, min(vmem_cap - 16 * _MIB, 96 * _MIB))

    x_itemsize = x3.dtype.itemsize
    out_itemsize = jnp.dtype(x_nchw.dtype).itemsize
    fixed_bytes = (2 * C * E * jnp.dtype(w_dtype).itemsize   # double-buffered weight
                   + 4 * (C + E) * 4                          # bn scale/offset blocks
                   + 64 * C * 4                               # f32 accumulator (bt<=64)
                   + 2 * 64 * E * out_itemsize                # output double buffer
                   + 2 * _MIB)                                # Mosaic internal headroom
    x_budget = max(2 * _MIB, vmem_limit - fixed_bytes)

    bt, ts = _select_tiles(B_pad, C, HW, x_itemsize, x_budget)
    needs_mask = (HW % ts) != 0
    spatial_steps = pl.cdiv(HW, ts)
    grid = (B_pad // bt, spatial_steps)

    # Deeper pipelining only when the spatial tile was forced small and there
    # are enough steps for a third buffer to matter (and it fits in VMEM).
    n_buf = 2
    if ts <= 256 and spatial_steps >= 4 and \
            3 * bt * C * ts * x_itemsize <= x_budget:
        n_buf = 3
    x_spec_kwargs = dict(pipeline_mode=pl.Buffered(3)) if n_buf == 3 else {}

    actual_bytes = n_buf * bt * C * ts * x_itemsize + fixed_bytes
    vmem_limit_bytes = int(min(max(vmem_limit, actual_bytes + 4 * _MIB),
                               vmem_cap - 4 * _MIB))

    kernel = functools.partial(_gp_bn_fc_bn_kernel,
                               hw=HW, ts=ts, needs_mask=needs_mask)

    cost = pl.CostEstimate(
        flops=int(B_pad * C * HW + 2 * B_pad * C * E),
        transcendentals=0,
        bytes_accessed=int(x3.size * x_itemsize
                           + w_t.size * jnp.dtype(w_dtype).itemsize
                           + B_pad * E * out_itemsize),
    )

    out = pl.pallas_call(
        kernel,
        out_shape=jax.ShapeDtypeStruct((B_pad, E), x_nchw.dtype),
        grid=grid,
        in_specs=[
            pl.BlockSpec((bt, C, ts), lambda b, k: (b, 0, k),
                         **x_spec_kwargs),                    # streamed input
            pl.BlockSpec((C, E), lambda b, k: (0, 0)),        # resident weight
            pl.BlockSpec((1, C), lambda b, k: (0, 0)),
            pl.BlockSpec((1, C), lambda b, k: (0, 0)),
            pl.BlockSpec((1, E), lambda b, k: (0, 0)),
            pl.BlockSpec((1, E), lambda b, k: (0, 0)),
        ],
        out_specs=pl.BlockSpec((bt, E), lambda b, k: (b, 0)),
        scratch_shapes=[pltpu.VMEM((bt, C), jnp.float32)],    # f32 accumulator
        compiler_params=pltpu.CompilerParams(
            dimension_semantics=("parallel", "arbitrary"),    # batch across cores
            vmem_limit_bytes=vmem_limit_bytes,
        ),
        cost_estimate=cost,
    )(x3, w_t, s1, o1, s2, o2)
    return out[:B].reshape(B, E, 1, 1)


def _reference(x, w_fc, g1, b1, rm1, rv1, g2, b2, rm2, rv2, eps=EPS):
    B, C, H, W = x.shape
    E = w_fc.shape[0]
    pooled = jnp.mean(x.reshape(B, C, H * W).astype(jnp.float32), axis=-1)   # GAP
    h = (pooled - rm1.reshape(1, C)) * lax.rsqrt(rv1.reshape(1, C) + eps) \
        * g1.reshape(1, C) + b1.reshape(1, C)                                # bn1 (eval)
    y = h @ w_fc.reshape(E, C).T                                             # 1x1 conv
    o = (y - rm2.reshape(1, E)) * lax.rsqrt(rv2.reshape(1, E) + eps) \
        * g2.reshape(1, E) + b2.reshape(1, E)                                # bn2 (eval)
    return o.reshape(B, E, 1, 1)


def _make_inputs(key, B, C, H, W, E, dtype=jnp.float32):
    ks = jax.random.split(key, 8)
    x = jax.random.normal(ks[0], (B, C, H, W), dtype=dtype)
    w_fc = jax.random.normal(ks[1], (E, C, 1, 1), dtype=jnp.float32) / jnp.sqrt(
        jnp.float32(C))
    g1 = 1.0 + 0.1 * jax.random.normal(ks[2], (C,), dtype=jnp.float32)
    b1 = jnp.zeros((C,), dtype=jnp.float32)          # bias frozen at init (0)
    rm1 = 0.1 * jax.random.normal(ks[3], (C,), dtype=jnp.float32)
    rv1 = jax.random.uniform(ks[4], (C,), minval=0.5, maxval=1.5, dtype=jnp.float32)
    g2 = 1.0 + 0.1 * jax.random.normal(ks[5], (E,), dtype=jnp.float32)
    b2 = jnp.zeros((E,), dtype=jnp.float32)
    rm2 = 0.1 * jax.random.normal(ks[6], (E,), dtype=jnp.float32)
    rv2 = jax.random.uniform(ks[7], (E,), minval=0.5, maxval=1.5, dtype=jnp.float32)
    return (x, w_fc, g1, b1, rm1, rv1, g2, b2, rm2, rv2)


if __name__ == "__main__":
    key = jax.random.PRNGKey(0)
    k1, k2 = jax.random.split(key)

    # Config 1: HW divides the spatial tile, >1 spatial step (accumulator path).
    args1 = _make_inputs(k1, B=2, C=32, H=64, W=64, E=64)
    out1 = jax.block_until_ready(gp_bn_fc_bn(*args1))
    ref1 = _reference(*args1)
    assert out1.shape == (2, 64, 1, 1)
    assert jnp.allclose(out1, ref1, atol=1e-4, rtol=1e-4), "mismatch (config 1)"

    # Config 2: ragged spatial tail + batch not divisible by 8 (mask + padding).
    args2 = _make_inputs(k2, B=10, C=16, H=18, W=18, E=32)
    out2 = jax.block_until_ready(gp_bn_fc_bn(*args2))
    ref2 = _reference(*args2)
    assert out2.shape == (10, 32, 1, 1)
    assert jnp.allclose(out2, ref2, atol=1e-4, rtol=1e-4), "mismatch (config 2)"

    print("KERNEL_OK")
</pallas_src>

<mosaic_0001>
module attributes {stable_mosaic.version = 11 : i64} {
  func.func @_gp_bn_fc_bn_kernel(%arg0: i32, %arg1: i32, %arg2: memref<2x32x2048xf32, #tpu.memory_space<vmem>>, %arg3: memref<32x64xf32, #tpu.memory_space<vmem>>, %arg4: memref<1x32xf32, #tpu.memory_space<vmem>>, %arg5: memref<1x32xf32, #tpu.memory_space<vmem>>, %arg6: memref<1x64xf32, #tpu.memory_space<vmem>>, %arg7: memref<1x64xf32, #tpu.memory_space<vmem>>, %arg8: memref<2x64xf32, #tpu.memory_space<vmem>>, %arg9: memref<2x32xf32, #tpu.memory_space<vmem>>) attributes {dimension_semantics = [#tpu.dimension_semantics<parallel>, #tpu.dimension_semantics<arbitrary>], iteration_bounds = array<i64: 1, 2>, scalar_prefetch = 0 : i64, scratch_operands = 1 : i64, tpu.core_type = #tpu.core_type<tc>, window_params = [{transform_indices = @transform_0, window_bounds = array<i64: 2, 32, 2048>}, {pipeline_mode = #tpu.pipeline_mode<synchronous>, transform_indices = @transform_1, window_bounds = array<i64: 32, 64>}, {pipeline_mode = #tpu.pipeline_mode<synchronous>, transform_indices = @transform_2, window_bounds = array<i64: 1, 32>}, {pipeline_mode = #tpu.pipeline_mode<synchronous>, transform_indices = @transform_3, window_bounds = array<i64: 1, 32>}, {pipeline_mode = #tpu.pipeline_mode<synchronous>, transform_indices = @transform_4, window_bounds = array<i64: 1, 64>}, {pipeline_mode = #tpu.pipeline_mode<synchronous>, transform_indices = @transform_5, window_bounds = array<i64: 1, 64>}, {transform_indices = @transform_6, window_bounds = array<i64: 2, 64>}]} {
    %c0_i32 = arith.constant 0 : i32
    %0 = arith.cmpi eq, %arg1, %c0_i32 : i32
    %1 = arith.extui %0 : i1 to i32
    %c0_i32_0 = arith.constant 0 : i32
    %2 = arith.cmpi ne, %1, %c0_i32_0 : i32
    scf.if %2 {
      %cst_8 = arith.constant 0.000000e+00 : f32
      %11 = vector.broadcast %cst_8 : f32 to vector<2x32xf32>
      %c0_9 = arith.constant 0 : index
      %c0_10 = arith.constant 0 : index
      %12 = vector.load %arg9[%c0_9, %c0_10] : memref<2x32xf32, #tpu.memory_space<vmem>>, vector<2x32xf32>
      tpu.vector_store %arg9[%c0_9, %c0_10], %11 {strides = array<i32>} : memref<2x32xf32, #tpu.memory_space<vmem>>, vector<2x32xf32>,
    } else {
    }
    %c0 = arith.constant 0 : index
    %c0_1 = arith.constant 0 : index
    %c0_2 = arith.constant 0 : index
    %3 = vector.load %arg2[%c0, %c0_1, %c0_2] : memref<2x32x2048xf32, #tpu.memory_space<vmem>>, vector<2x32x2048xf32>
    %c0_3 = arith.constant 0 : index
    %c0_4 = arith.constant 0 : index
    %4 = vector.load %arg9[%c0_3, %c0_4] : memref<2x32xf32, #tpu.memory_space<vmem>>, vector<2x32xf32>
    %cst = arith.constant dense<0.000000e+00> : vector<2x32xf32>
    %5 = vector.multi_reduction <add>, %3, %cst [2] : vector<2x32x2048xf32> to vector<2x32xf32>
    %6 = arith.addf %4, %5 : vector<2x32xf32>
    %c0_5 = arith.constant 0 : index
    %c0_6 = arith.constant 0 : index
    %7 = vector.load %arg9[%c0_5, %c0_6] : memref<2x32xf32, #tpu.memory_space<vmem>>, vector<2x32xf32>
    tpu.vector_store %arg9[%c0_5, %c0_6], %6 {strides = array<i32>} : memref<2x32xf32, #tpu.memory_space<vmem>>, vector<2x32xf32>,
    %c1_i32 = arith.constant 1 : i32
    %8 = arith.cmpi eq, %arg1, %c1_i32 : i32
    %9 = arith.extui %8 : i1 to i32
    %c0_i32_7 = arith.constant 0 : i32
    %10 = arith.cmpi ne, %9, %c0_i32_7 : i32
    scf.if %10 {
      %c0_8 = arith.constant 0 : index
      %c0_9 = arith.constant 0 : index
      %11 = vector.load %arg9[%c0_8, %c0_9] : memref<2x32xf32, #tpu.memory_space<vmem>>, vector<2x32xf32>
      %cst_10 = arith.constant 2.44140625E-4 : f32
      %12 = vector.broadcast %cst_10 : f32 to vector<2x32xf32>
      %13 = arith.mulf %11, %12 : vector<2x32xf32>
      %c0_11 = arith.constant 0 : index
      %c0_12 = arith.constant 0 : index
      %14 = vector.load %arg4[%c0_11, %c0_12] : memref<1x32xf32, #tpu.memory_space<vmem>>, vector<1x32xf32>
      %15 = vector.broadcast %14 : vector<1x32xf32> to vector<2x32xf32>
      %16 = arith.mulf %13, %15 : vector<2x32xf32>
      %c0_13 = arith.constant 0 : index
      %c0_14 = arith.constant 0 : index
      %17 = vector.load %arg5[%c0_13, %c0_14] : memref<1x32xf32, #tpu.memory_space<vmem>>, vector<1x32xf32>
      %18 = vector.broadcast %17 : vector<1x32xf32> to vector<2x32xf32>
      %19 = arith.addf %16, %18 : vector<2x32xf32>
      %c0_15 = arith.constant 0 : index
      %c0_16 = arith.constant 0 : index
      %20 = vector.load %arg3[%c0_15, %c0_16] : memref<32x64xf32, #tpu.memory_space<vmem>>, vector<32x64xf32>
      %cst_17 = arith.constant dense<0.000000e+00> : vector<2x64xf32>
      %21 = tpu.matmul %19, %20, %cst_17 {dimension_numbers = #tpu.dot_dimension_numbers<[1], [0], [0], [1], [0, 0, 1, 1], [], []>} : vector<2x32xf32>, vector<32x64xf32>, vector<2x64xf32> -> vector<2x64xf32>
      %c0_18 = arith.constant 0 : index
      %c0_19 = arith.constant 0 : index
      %22 = vector.load %arg6[%c0_18, %c0_19] : memref<1x64xf32, #tpu.memory_space<vmem>>, vector<1x64xf32>
      %23 = vector.broadcast %22 : vector<1x64xf32> to vector<2x64xf32>
      %24 = arith.mulf %21, %23 : vector<2x64xf32>
      %c0_20 = arith.constant 0 : index
      %c0_21 = arith.constant 0 : index
      %25 = vector.load %arg7[%c0_20, %c0_21] : memref<1x64xf32, #tpu.memory_space<vmem>>, vector<1x64xf32>
      %26 = vector.broadcast %25 : vector<1x64xf32> to vector<2x64xf32>
      %27 = arith.addf %24, %26 : vector<2x64xf32>
      %c0_22 = arith.constant 0 : index
      %c0_23 = arith.constant 0 : index
      %28 = vector.load %arg8[%c0_22, %c0_23] : memref<2x64xf32, #tpu.memory_space<vmem>>, vector<2x64xf32>
      tpu.vector_store %arg8[%c0_22, %c0_23], %27 {strides = array<i32>} : memref<2x64xf32, #tpu.memory_space<vmem>>, vector<2x64xf32>,
    } else {
    }
    return
  }
  func.func @transform_0(%arg0: i32, %arg1: i32) -> (i32, i32, i32) {
    %c0_i32 = arith.constant 0 : i32
    %c0_i32_0 = arith.constant 0 : i32
    return %arg0, %c0_i32, %arg1 : i32, i32, i32
  }
  func.func @transform_1(%arg0: i32, %arg1: i32) -> (i32, i32) {
    %c0_i32 = arith.constant 0 : i32
    %c0_i32_0 = arith.constant 0 : i32
    %c0_i32_1 = arith.constant 0 : i32
    return %c0_i32, %c0_i32_0 : i32, i32
  }
  func.func @transform_2(%arg0: i32, %arg1: i32) -> (i32, i32) {
    %c0_i32 = arith.constant 0 : i32
    %c0_i32_0 = arith.constant 0 : i32
    %c0_i32_1 = arith.constant 0 : i32
    return %c0_i32, %c0_i32_0 : i32, i32
  }
  func.func @transform_3(%arg0: i32, %arg1: i32) -> (i32, i32) {
    %c0_i32 = arith.constant 0 : i32
    %c0_i32_0 = arith.constant 0 : i32
    %c0_i32_1 = arith.constant 0 : i32
    return %c0_i32, %c0_i32_0 : i32, i32
  }
  func.func @transform_4(%arg0: i32, %arg1: i32) -> (i32, i32) {
    %c0_i32 = arith.constant 0 : i32
    %c0_i32_0 = arith.constant 0 : i32
    %c0_i32_1 = arith.constant 0 : i32
    return %c0_i32, %c0_i32_0 : i32, i32
  }
  func.func @transform_5(%arg0: i32, %arg1: i32) -> (i32, i32) {
    %c0_i32 = arith.constant 0 : i32
    %c0_i32_0 = arith.constant 0 : i32
    %c0_i32_1 = arith.constant 0 : i32
    return %c0_i32, %c0_i32_0 : i32, i32
  }
  func.func @transform_6(%arg0: i32, %arg1: i32) -> (i32, i32) {
    %c0_i32 = arith.constant 0 : i32
    %c0_i32_0 = arith.constant 0 : i32
    return %arg0, %c0_i32 : i32, i32
  }
}

</mosaic_0001>

<bundles_post_ra>
// kernel: tpu_custom_call.1
= control target key start
LH: loop header
LB: loop body
LE: loop exit
PB: predicated region body
PF: predicated region fallthrough
CT: control target
= control target key end

     0   :  { %11 = vsyncpa [#allocation4], 0  ;;  %s1476_s0 = inlined_call_operand.hbm [shape: f32[2,32,4096], index: 0, kind: input, shape index: {}]   ;;  %s1477_s1 = inlined_call_operand.hbm [shape: f32[32,64], index: 1, kind: input, shape index: {}]   ;;  %s1478_s2 = inlined_call_operand.vmem [shape: f32[1,32], index: 2, kind: input, shape index: {}]   ;;  %s1479_s3 = inlined_call_operand.vmem [shape: f32[1,32], index: 3, kind: input, shape index: {}]   ;;  %s1480_s4 = inlined_call_operand.vmem [shape: f32[1,64], index: 4, kind: input, shape index: {}]   ;;  %s1481_s5 = inlined_call_operand.vmem [shape: f32[1,64], index: 5, kind: input, shape index: {}]   ;;  %s1482_s6 = inlined_call_operand.hbm [shape: f32[2,64], index: 6, kind: output, shape index: {}]  }
   0x1   :  { %13 = vsyncpa [#allocation4 + $0x1], 0 }
   0x2   :  { %14 = vsyncpa [#allocation7], 0 }
   0x3   :  { %15 = vsyncpa [#allocation5], 0  ;;  %s1144_s21 = smov 0   ;;  %s1146_s22 = smov 0  }
   0x4   :  { %s1148_s23 = smov 0   ;;  %s1150_s24 = smov 0  }
   0x5   :  { %s1152_s25 = smov 0   ;;  %s1154_s26 = smov 0  }
   0x6 LB: > { %s1488_s27 = sadd.s32 4294967295, %s1096_s26   ;;  %p49_p0 = scmp.ne.s32.totalorder %s1084_s23, %s1080_s22  ;;  %s1096_s26 = sphi %s1154_s26, %s21_s26   ;;  %s1092_s25 = sphi %s1152_s25, %s1504_s25   ;;  %s1088_s24 = sphi %s1150_s24, %s1503_s24   ;;  %s1084_s23 = sphi %s1148_s23, %s1502_s23   ;;  %s1080_s22 = sphi %s1146_s22, %s1501_s22   ;;  %s1076_s21 = sphi %s1144_s21, %s1500_s21  }
   0x7   : > { %p50_p1 = scmp.eq.s32.totalorder %s1096_s26, 0  ;;  %p55_p2 = scmp.ne.s32.totalorder %s1080_s22, %s1076_s21 }
   0x8   : > { %p1179_p3 = scmp.eq.s32.totalorder %s1488_s27, 0  ;;  %p830_p4 = scmp.ge.s32.totalorder %s1096_s26, 1 }
   0x9   : > { %p51_p5 = por %p50_p1, %p49_p0  ;;  %p197_p6 = scmp.lt.s32.totalorder %s1096_s26, 3 }
   0xa   : > { %s1489_s28 = scalar_select %p1179_p3, 1, 0 }
   0xb   : > { %p1187_p7 = por %p1179_p3, %p55_p2  ;;  %p1191_p8 = pnand %p830_p4, %p197_p6 }
   0xc   : > { %s1098_s7 = smov [#allocation6]   ;;  %p892_p11 = scmp.lt.s32.totalorder %s1096_s26, 2 }
   0xd   : > { %s1490_s29 = scalar_select %p1187_p7, 1, 0 }
   0xe   : > { %s1491_s30 = scalar_select %p1191_p8, 1, 0 }
   0xf   : > { %s209_s8 = sshll.u32 %s1098_s7, 4  ;;  %p883_p9 = pneg %p1191_p8  ;;  %s210_s8 = int_to_ptr.vmem [resolvable:$true] %s209_s8 }
  0x10   : > { %s42_s10 = sadd.s32 1, %s1084_s23  ;;  %p1205_p12 = pnand %p892_p11, %p51_p5 }
  0x11   : > { %p1199_p10 = pnand %p883_p9, %p1179_p3  ;;  %s954_s14 = scalar_lea.hbm %s1477_s1, 512 }
  0x12   : > { %s1493_s11 = scalar_select %p1205_p12, 1, 0 }
  0x13   : > { %p955_p13 = scmp.ne.s32.totalorder %s1477_s1, %s954_s14  ;;  %p956_p0 = pneg %p1199_p10 }
  0x14   : > { %p961_p4 = scmp.lt.u32.totalorder %s954_s14, %s1477_s1 }
  0x15   : > { %p957_p1 = pnand %p956_p0, %p955_p13 }
  0x17   : > { %p958_p2 = pneg %p957_p1 }
  0x19   : > { %p963_p5 = pnand %p961_p4, %p958_p2 }
  0x1b   : > { %966 = shalt.err (!%p963_p5)
}
  0x1c   : > { %s967_s19 = scalar_lea.vmem %s210_s8, 512  ;;  %p975_p3 = scmp.lt.s32.totalorder %s210_s8, %s210_s8 }
  0x1d   : > { %p968_p6 = scmp.ne.s32.totalorder %s210_s8, %s967_s19  ;;  %p976_p7 = scmp.lt.s32.totalorder %s967_s19, %s967_s19 }
  0x1f   : > { %p970_p9 = pnand %p968_p6, %p956_p0  ;;  %p977_p8 = por %p976_p7, %p975_p3 }
  0x21   : > { %p971_p11 = pneg %p970_p9 }
  0x23   : > { %p978_p12 = pnand %p977_p8, %p971_p11 }
  0x25   : > { %981 = shalt.err (!%p978_p12)
}
  0x26   : > { %s1099_s20 = smov 128   ;;  %s1100_s21 = smov 8  }
  0x27   : > { %886 = dma.hbm_to_vmem [thread:$0]  (!%p1199_p10), %s1477_s1, 512, %s210_s8, [#allocation7], %s1099_s20, %s1099_s20, %s1100_s21  }
  0x28   : > { %s30_s13 = sadd.s32 1, %s1092_s25  ;;  %s235_s14 = sand.u32 1, %s1084_s23  }
  0x29   : > { %p31_p3 = scmp.ge.s32.totalorder %s30_s13, 2  ;;  %s833_s15 = sshll.u32 %s235_s14, 10 }
  0x2a   : > { %s850_s16 = sshll.u32 %s1092_s25, 11  ;;  %s239_s8 = scalar_lea.vmem [#allocation3], %s833_s15 }
  0x2b   : > { %s1506_s13 = smov (%p31_p3, %s30_s13), 0  ;;  %s1235_s9 = scalar_lea.hbm %s1476_s0, %s850_s16 }
  0x2c   : > { %s38_s19 = ssub.s32 %s1092_s25, %s1506_s13  ;;  %s249_s21 = sshll.u32 %s239_s8, 4  ;;  %s1239_s21 = int_to_ptr.vmem [resolvable:$true] %s249_s21 }
  0x2d   : > { %p40_p7 = scmp.eq.s32.totalorder %s38_s19, 0  ;;  %s1246_s12 = scalar_lea.sflag [#allocation4], %s235_s14 }
  0x2e   : > { %s982_s27 = scalar_lea.hbm %s1235_s9, 16384  ;;  %p1494_p10 = scmp.ne.s32.totalorder %s1493_s11, 0 }
  0x2f   : > { %s1244_s7 = scalar_select %p40_p7, %s1084_s23, %s42_s10  }
  0x30   : > { %p983_p8 = scmp.ne.s32.totalorder %s1235_s9, %s982_s27  ;;  %p984_p12 = pneg %p1494_p10 }
  0x31   : > { %s987_s15 = scalar_lea.hbm %s1476_s0, 32768  ;;  %p988_p1 = scmp.lt.u32.totalorder %s1235_s9, %s1476_s0 }
  0x32   : > { %p985_p13 = pnand %p984_p12, %p983_p8  ;;  %p989_p2 = scmp.lt.u32.totalorder %s987_s15, %s982_s27 }
  0x33   : > { %p991_p5 = scmp.lt.u32.totalorder %s982_s27, %s1235_s9 }
  0x34   : > { %p986_p0 = pneg %p985_p13  ;;  %p990_p4 = por %p989_p2, %p988_p1 }
  0x36   : > { %p992_p6 = por %p991_p5, %p990_p4 }
  0x38   : > { %p993_p9 = pnand %p992_p6, %p986_p0 }
  0x3a   : > { %996 = shalt.err (!%p993_p9)
}
  0x3b   : > { %s997_s10 = scalar_lea.vmem %s1239_s21, 16384  ;;  %s1101_s14 = smov [#allocation3]  }
  0x3c   : > { %p998_p11 = scmp.ne.s32.totalorder %s1239_s21, %s997_s10  ;;  %s1002_s8 = sshll.u32 %s1101_s14, 4  ;;  %s1003_s8 = int_to_ptr.vmem [resolvable:$false] %s1002_s8 }
  0x3d   : > { %s1004_s16 = scalar_lea.vmem %s1003_s8, 32768  ;;  %p1005_p8 = scmp.lt.s32.totalorder %s1239_s21, %s1003_s8 }
  0x3e   : > { %p1000_p3 = pnand %p998_p11, %p984_p12  ;;  %p1006_p13 = scmp.lt.s32.totalorder %s1004_s16, %s997_s10 }
  0x40   : > { %p1001_p7 = pneg %p1000_p3  ;;  %p1007_p1 = por %p1006_p13, %p1005_p8 }
  0x42   : > { %p1008_p2 = pnand %p1007_p1, %p1001_p7 }
  0x44   : > { %1011 = shalt.err (!%p1008_p2)
}
  0x45   : > { %s1102_s27 = smov 4096   ;;  %s1103_s17 = smov 2048  }
  0x46   : > { %890 = dma.hbm_to_vmem [thread:$0]  (!%p1494_p10), %s1235_s9, 16384, %s1239_s21, %s1246_s12, %s1102_s27, %s1103_s17, %s1099_s20  }
  0x47   : > { %p1495_p12 = scmp.ne.s32.totalorder %s1491_s30, 0 }
  0x48   : > { %s263_s15 = sand.u32 (!%p1495_p12), 1, %s1080_s22   ;;  %p1496_p0 = scmp.ne.s32.totalorder (!%p1495_p12), %s1490_s29, 0 }
  0x49   : > { %261 = sbr.rel (%p1495_p12) target bundleno = 557 (0x22d), region = 44  ;;  %s837_s18 = sshll.u32 (!%p1495_p12), %s263_s15, 10 }
  0x4a   : > { %s264_s19 = scalar_lea.sflag (!%p1495_p12), [#allocation4], %s263_s15  ;;  %s1278_s10 = scalar_lea.vmem (!%p1495_p12), [#allocation3], %s837_s18 }
  0x50   : > { %1063 = dma.done.wait (%p1496_p0), %s264_s19, 16384  }
  0x51   : > { %1065 = vsyncadd (%p1496_p0), %s264_s19, 4294950912  ;;  %p1497_p4 = scmp.ne.s32.totalorder %s1489_s28, 0 }
  0x53   : > { %1067 = dma.done.wait (%p1497_p4), [#allocation7], 512  }
  0x54   : > { %1069 = vsyncadd (%p1497_p4), [#allocation7], 4294966784  ;;  %p839_p10 = scmp.ne.s32.totalorder %s1088_s24, 0 }
  0x55   : > { %vm301_vm0 = vcmask (!%p839_p10), 254976   ;;  %v1104_v0 = vmov (!%p839_p10), 0.0  }
  0x56   : > { %300 = sbr.rel (%p839_p10) target bundleno = 93 (0x5d), region = 56  ;;  %302 = vst.msk [vmem:[#allocation2] sm:$0x3] (!%p839_p10), %vm301_vm0, %v1104_v0 }
  0x5d PF: > { %v367_v1 = vld [vmem:[%s1278_s10 + $0x200] sm:$0xff]  ;;  %v368_v2 = vld [vmem:[%s1278_s10 + $0x208] sm:$0xff]  ;;  %v369_v3 = vld [vmem:[%s1278_s10 + $0x210] sm:$0xff]  ;;  %vm587_vm1 = vcmask 130112   ;;  %vm594_vm2 = vcmask 195712   ;;  %vm601_vm3 = vcmask 261312  }
  0x5e   : > { %v500_v4 = vadd.f32 %v368_v2, %v367_v1  ;;  %v370_v5 = vld [vmem:[%s1278_s10 + $0x218] sm:$0xff]  ;;  %v371_v7 = vld [vmem:[%s1278_s10 + $0x220] sm:$0xff]  ;;  %v304_v10 = vld [vmem:[%s1278_s10 + $0x8] sm:$0xff]  ;;  %vm622_vm4 = vcmask 1041409   ;;  %vm626_vm5 = vcmask 254976   ;;  %p840_p5 = scmp.ne.s32.totalorder %s1088_s24, 1 }
  0x5f   : > { %v303_v9 = vld [vmem:[%s1278_s10] sm:$0xff]  ;;  %v372_v11 = vld [vmem:[%s1278_s10 + $0x228] sm:$0xff]  ;;  %v305_v12 = vld [vmem:[%s1278_s10 + $0x10] sm:$0xff]  ;;  %vm1106_vm6 = vmmov (!%p840_p5), 0   ;;  %vm654_vm7 = vcmask (!%p840_p5), 261120   ;;  %vm744_vm8 = vcmask (!%p840_p5), 517120  }
  0x60   : > { %v501_v6 = vadd.f32 %v500_v4, %v369_v3  ;;  %v432_v13 = vadd.f32 %v304_v10, %v303_v9  ;;  %v306_v15 = vld [vmem:[%s1278_s10 + $0x18] sm:$0xff]  ;;  %v373_v16 = vld [vmem:[%s1278_s10 + $0x230] sm:$0xff]  ;;  %v307_v19 = vld [vmem:[%s1278_s10 + $0x20] sm:$0xff] }
  0x61   : > { %v374_v20 = vld [vmem:[%s1278_s10 + $0x238] sm:$0xff]  ;;  %v383_v22 = vld [vmem:[%s1278_s10 + $0x280] sm:$0xff]  ;;  %v308_v24 = vld [vmem:[%s1278_s10 + $0x28] sm:$0xff] }
  0x62   : > { %v502_v8 = vadd.f32 %v501_v6, %v370_v5  ;;  %v433_v17 = vadd.f32 %v432_v13, %v305_v12  ;;  %v384_v25 = vld [vmem:[%s1278_s10 + $0x288] sm:$0xff]  ;;  %v385_v26 = vld [vmem:[%s1278_s10 + $0x290] sm:$0xff]  ;;  %v375_v27 = vld [vmem:[%s1278_s10 + $0x240] sm:$0xff] }
  0x63   : > { %v517_v29 = vadd.f32 %v384_v25, %v383_v22  ;;  %v309_v31 = vld [vmem:[%s1278_s10 + $0x30] sm:$0xff]  ;;  %v386_v32 = vld [vmem:[%s1278_s10 + $0x298] sm:$0xff]  ;;  %v376_v33 = vld [vmem:[%s1278_s10 + $0x248] sm:$0xff] }
  0x64   : > { %v503_v14 = vadd.f32 %v502_v8, %v371_v7  ;;  %v434_v21 = vadd.f32 %v433_v17, %v306_v15  ;;  %v377_v36 = vld [vmem:[%s1278_s10 + $0x250] sm:$0xff]  ;;  %v310_v38 = vld [vmem:[%s1278_s10 + $0x38] sm:$0xff]  ;;  %v387_v39 = vld [vmem:[%s1278_s10 + $0x2a0] sm:$0xff] }
  0x65   : > { %v518_v35 = vadd.f32 %v517_v29, %v385_v26  ;;  %v319_v42 = vld [vmem:[%s1278_s10 + $0x80] sm:$0xff]  ;;  %v320_v43 = vld [vmem:[%s1278_s10 + $0x88] sm:$0xff]  ;;  %v321_v44 = vld [vmem:[%s1278_s10 + $0x90] sm:$0xff] }
  0x66   : > { %v504_v18 = vadd.f32 %v503_v14, %v372_v11  ;;  %v435_v28 = vadd.f32 %v434_v21, %v307_v19  ;;  %v311_v46 = vld [vmem:[%s1278_s10 + $0x40] sm:$0xff]  ;;  %v388_v47 = vld [vmem:[%s1278_s10 + $0x2a8] sm:$0xff]  ;;  %v449_v48 = vadd.f32 %v320_v43, %v319_v42  ;;  %v378_v49 = vld [vmem:[%s1278_s10 + $0x258] sm:$0xff] }
  0x67   : > { %v519_v41 = vadd.f32 %v518_v35, %v386_v32  ;;  %v322_v52 = vld [vmem:[%s1278_s10 + $0x98] sm:$0xff]  ;;  %v379_v53 = vld [vmem:[%s1278_s10 + $0x260] sm:$0xff]  ;;  %v312_v55 = vld [vmem:[%s1278_s10 + $0x48] sm:$0xff] }
  0x68   : > { %v505_v23 = vadd.f32 %v504_v18, %v373_v16  ;;  %v436_v34 = vadd.f32 %v435_v28, %v308_v24  ;;  %v389_v56 = vld [vmem:[%s1278_s10 + $0x2b0] sm:$0xff]  ;;  %v450_v57 = vadd.f32 %v449_v48, %v321_v44  ;;  %v380_v58 = vld [vmem:[%s1278_s10 + $0x268] sm:$0xff]  ;;  %v323_v62 = vld [vmem:[%s1278_s10 + $0xa0] sm:$0xff] }
  0x69   : > { %v520_v51 = vadd.f32 %v519_v41, %v387_v39  ;;  %v313_v59 = vld [vmem:[%s1278_s10 + $0x50] sm:$0xff]  ;;  %v390_v0 = vld [vmem:[%s1278_s10 + $0x2b8] sm:$0xff]  ;;  %v399_v2 = vld [vmem:[%s1278_s10 + $0x300] sm:$0xff] }
  0x6a   : > { %v506_v30 = vadd.f32 %v505_v23, %v374_v20  ;;  %v437_v40 = vadd.f32 %v436_v34, %v309_v31  ;;  %v451_v1 = vadd.f32 %v450_v57, %v322_v52  ;;  %v400_v3 = vld [vmem:[%s1278_s10 + $0x308] sm:$0xff]  ;;  %v381_v4 = vld [vmem:[%s1278_s10 + $0x270] sm:$0xff]  ;;  %v314_v11 = vld [vmem:[%s1278_s10 + $0x58] sm:$0xff] }
  0x6b   : > { %v521_v61 = vadd.f32 %v520_v51, %v388_v47  ;;  %v324_v7 = vld [vmem:[%s1278_s10 + $0xa8] sm:$0xff]  ;;  %v401_v8 = vld [vmem:[%s1278_s10 + $0x310] sm:$0xff]  ;;  %v534_v9 = vadd.f32 %v400_v3, %v399_v2  ;;  %v391_v12 = vld [vmem:[%s1278_s10 + $0x2c0] sm:$0xff] }
  0x6c   : > { %v507_v37 = vadd.f32 %v506_v30, %v375_v27  ;;  %v438_v50 = vadd.f32 %v437_v40, %v310_v38  ;;  %v452_v13 = vadd.f32 %v451_v1, %v323_v62  ;;  %v402_v14 = vld [vmem:[%s1278_s10 + $0x318] sm:$0xff]  ;;  %v315_v16 = vld [vmem:[%s1278_s10 + $0x60] sm:$0xff]  ;;  %v325_v19 = vld [vmem:[%s1278_s10 + $0xb0] sm:$0xff] }
  0x6d   : > { %v522_v6 = vadd.f32 %v521_v61, %v389_v56  ;;  %v382_v15 = vld [vmem:[%s1278_s10 + $0x278] sm:$0xff]  ;;  %v535_v20 = vadd.f32 %v534_v9, %v401_v8  ;;  %v316_v22 = vld [vmem:[%s1278_s10 + $0x68] sm:$0xff]  ;;  %v403_v25 = vld [vmem:[%s1278_s10 + $0x320] sm:$0xff] }
  0x6e   : > { %v508_v45 = vadd.f32 %v507_v37, %v376_v33  ;;  %v439_v60 = vadd.f32 %v438_v50, %v311_v46  ;;  %v392_v23 = vld [vmem:[%s1278_s10 + $0x2c8] sm:$0xff]  ;;  %v453_v24 = vadd.f32 %v452_v13, %v324_v7  ;;  %v393_v27 = vld [vmem:[%s1278_s10 + $0x2d0] sm:$0xff]  ;;  %v326_v29 = vld [vmem:[%s1278_s10 + $0xb8] sm:$0xff] }
  0x6f   : > { %v523_v18 = vadd.f32 %v522_v6, %v390_v0  ;;  %v536_v30 = vadd.f32 %v535_v20, %v402_v14  ;;  %v335_v31 = vld [vmem:[%s1278_s10 + $0x100] sm:$0xff]  ;;  %v404_v34 = vld [vmem:[%s1278_s10 + $0x328] sm:$0xff]  ;;  %v317_v37 = vld [vmem:[%s1278_s10 + $0x70] sm:$0xff] }
  0x70   : > { %v509_v54 = vadd.f32 %v508_v45, %v377_v36  ;;  %v440_v5 = vadd.f32 %v439_v60, %v312_v55  ;;  %v454_v33 = vadd.f32 %v453_v24, %v325_v19  ;;  %v336_v35 = vld [vmem:[%s1278_s10 + $0x108] sm:$0xff]  ;;  %v337_v36 = vld [vmem:[%s1278_s10 + $0x110] sm:$0xff]  ;;  %v327_v40 = vld [vmem:[%s1278_s10 + $0xc0] sm:$0xff] }
  0x71   : > { %v524_v28 = vadd.f32 %v523_v18, %v391_v12  ;;  %v537_v41 = vadd.f32 %v536_v30, %v403_v25  ;;  %v466_v42 = vadd.f32 %v336_v35, %v335_v31  ;;  %v394_v44 = vld [vmem:[%s1278_s10 + $0x2d8] sm:$0xff]  ;;  %v405_v46 = vld [vmem:[%s1278_s10 + $0x330] sm:$0xff]  ;;  %v395_v50 = vld [vmem:[%s1278_s10 + $0x2e0] sm:$0xff] }
  0x72   : > { %v510_v63 = vadd.f32 %v509_v54, %v378_v49  ;;  %v441_v17 = vadd.f32 %v440_v5, %v313_v59  ;;  %v455_v45 = vadd.f32 %v454_v33, %v326_v29  ;;  %v338_v47 = vld [vmem:[%s1278_s10 + $0x118] sm:$0xff]  ;;  %v328_v52 = vld [vmem:[%s1278_s10 + $0xc8] sm:$0xff]  ;;  %v329_v55 = vld [vmem:[%s1278_s10 + $0xd0] sm:$0xff] }
  0x73   : > { %v525_v39 = vadd.f32 %v524_v28, %v392_v23  ;;  %v318_v48 = vld [vmem:[%s1278_s10 + $0x78] sm:$0xff]  ;;  %v467_v54 = vadd.f32 %v466_v42, %v337_v36  ;;  %v416_v0 = vld [vmem:[%s1278_s10 + $0x388] sm:$0xff]  ;;  %v417_v1 = vld [vmem:[%s1278_s10 + $0x390] sm:$0xff] }
  0x74   : > { %v511_v10 = vadd.f32 %v510_v63, %v379_v53  ;;  %v442_v26 = vadd.f32 %v441_v17, %v314_v11  ;;  %v538_v53 = vadd.f32 %v537_v41, %v404_v34  ;;  %v456_v56 = vadd.f32 %v455_v45, %v327_v40  ;;  %v406_v57 = vld [vmem:[%s1278_s10 + $0x338] sm:$0xff]  ;;  %v415_v63 = vld [vmem:[%s1278_s10 + $0x380] sm:$0xff]  ;;  %v396_v2 = vld [vmem:[%s1278_s10 + $0x2e8] sm:$0xff] }
  0x75   : > { %v526_v51 = vadd.f32 %v525_v39, %v393_v27  ;;  %v468_v62 = vadd.f32 %v467_v54, %v338_v47  ;;  %v340_v5 = vld [vmem:[%s1278_s10 + $0x128] sm:$0xff]  ;;  %v551_v6 = vadd.f32 %v416_v0, %v415_v63  ;;  %v397_v8 = vld [vmem:[%s1278_s10 + $0x2f0] sm:$0xff]  ;;  %v418_v13 = vld [vmem:[%s1278_s10 + $0x398] sm:$0xff] }
  0x76   : > { %v512_v21 = vadd.f32 %v511_v10, %v380_v58  ;;  %v443_v38 = vadd.f32 %v442_v26, %v315_v16  ;;  %v339_v58 = vld [vmem:[%s1278_s10 + $0x120] sm:$0xff]  ;;  %v539_v61 = vadd.f32 %v538_v53, %v405_v46  ;;  %v457_v3 = vadd.f32 %v456_v56, %v328_v52  ;;  %v330_v10 = vld [vmem:[%s1278_s10 + $0xd8] sm:$0xff]  ;;  %v408_v16 = vld [vmem:[%s1278_s10 + $0x348] sm:$0xff] }
  0x77   : > { %v527_v60 = vadd.f32 %v526_v51, %v394_v44  ;;  %v469_v12 = vadd.f32 %v468_v62, %v339_v58  ;;  %v398_v14 = vld [vmem:[%s1278_s10 + $0x2f8] sm:$0xff]  ;;  %v341_v17 = vld [vmem:[%s1278_s10 + $0x130] sm:$0xff]  ;;  %v552_v18 = vadd.f32 %v551_v6, %v417_v1  ;;  %v331_v20 = vld [vmem:[%s1278_s10 + $0xe0] sm:$0xff] }
  0x78   : > { %v513_v32 = vadd.f32 %v512_v21, %v381_v4  ;;  %v444_v49 = vadd.f32 %v443_v38, %v316_v22  ;;  %v407_v4 = vld [vmem:[%s1278_s10 + $0x340] sm:$0xff]  ;;  %v540_v11 = vadd.f32 %v539_v61, %v406_v57  ;;  %v409_v21 = vld [vmem:[%s1278_s10 + $0x350] sm:$0xff]  ;;  %v342_v26 = vld [vmem:[%s1278_s10 + $0x138] sm:$0xff] }
  0x79   : > { %v528_v9 = vadd.f32 %v527_v60, %v395_v50  ;;  %v470_v23 = vadd.f32 %v469_v12, %v340_v5  ;;  %v419_v24 = vld [vmem:[%s1278_s10 + $0x3a0] sm:$0xff]  ;;  %v553_v27 = vadd.f32 %v552_v18, %v418_v13  ;;  %v352_v29 = vld [vmem:[%s1278_s10 + $0x188] sm:$0xff]  ;;  %v353_v35 = vld [vmem:[%s1278_s10 + $0x190] sm:$0xff] }
  0x7a   : > { %v514_v43 = vadd.f32 %v513_v32, %v382_v15  ;;  %v445_v59 = vadd.f32 %v444_v49, %v317_v37  ;;  %v458_v15 = vadd.f32 %v457_v3, %v329_v55  ;;  %v541_v22 = vadd.f32 %v540_v11, %v407_v4  ;;  %v351_v28 = vld [vmem:[%s1278_s10 + $0x180] sm:$0xff]  ;;  %v332_v31 = vld [vmem:[%s1278_s10 + $0xe8] sm:$0xff]  ;;  %v410_v38 = vld [vmem:[%s1278_s10 + $0x358] sm:$0xff] }
  0x7b   : > { %v529_v19 = vadd.f32 %v528_v9, %v396_v2  ;;  %v471_v33 = vadd.f32 %v470_v23, %v341_v17  ;;  %v420_v34 = vld [vmem:[%s1278_s10 + $0x3a8] sm:$0xff]  ;;  %v483_v36 = vadd.f32 %v352_v29, %v351_v28  ;;  %v343_v39 = vld [vmem:[%s1278_s10 + $0x140] sm:$0xff]  ;;  %v554_v40 = vadd.f32 %v553_v27, %v419_v24  ;;  %v354_v41 = vld [vmem:[%s1278_s10 + $0x198] sm:$0xff] }
  0x7c   : > { %515 = vadd.xlane.f32.xlu1 %v514_v43  ;;  %v446_v7 = vadd.f32 %v445_v59, %v318_v48  ;;  %v459_v25 = vadd.f32 %v458_v15, %v330_v10  ;;  %v542_v32 = vadd.f32 %v541_v22, %v408_v16  ;;  %v333_v43 = vld [vmem:[%s1278_s10 + $0xf0] sm:$0xff]  ;;  %v411_v49 = vld [vmem:[%s1278_s10 + $0x360] sm:$0xff]  ;;  %v344_v50 = vld [vmem:[%s1278_s10 + $0x148] sm:$0xff] }
  0x7d   : > { %v530_v30 = vadd.f32 %v529_v19, %v397_v8  ;;  %v472_v45 = vadd.f32 %v471_v33, %v342_v26  ;;  %v421_v46 = vld [vmem:[%s1278_s10 + $0x3b0] sm:$0xff]  ;;  %v484_v47 = vadd.f32 %v483_v36, %v353_v35  ;;  %v555_v51 = vadd.f32 %v554_v40, %v420_v34  ;;  %v355_v52 = vld [vmem:[%s1278_s10 + $0x1a0] sm:$0xff]  ;;  %v334_v53 = vld [vmem:[%s1278_s10 + $0xf8] sm:$0xff] }
  0x7e   : > { %447 = vadd.xlane.f32.xlu0 %v446_v7  ;;  %v460_v37 = vadd.f32 %v459_v25, %v331_v20  ;;  %v543_v44 = vadd.f32 %v542_v32, %v409_v21  ;;  %v422_v56 = vld [vmem:[%s1278_s10 + $0x3b8] sm:$0xff]  ;;  %v412_v59 = vld [vmem:[%s1278_s10 + $0x368] sm:$0xff]  ;;  %v345_v60 = vld [vmem:[%s1278_s10 + $0x150] sm:$0xff] }
  0x7f   : > { %v531_v42 = vadd.f32 %v530_v30, %v398_v14  ;;  %v473_v55 = vadd.f32 %v472_v45, %v343_v39  ;;  %v485_v57 = vadd.f32 %v484_v47, %v354_v41  ;;  %v556_v61 = vadd.f32 %v555_v51, %v421_v46  ;;  %v356_v62 = vld [vmem:[%s1278_s10 + $0x1a8] sm:$0xff]  ;;  %v423_v1 = vld [vmem:[%s1278_s10 + $0x3c0] sm:$0xff]  ;;  %v413_v4 = vld [vmem:[%s1278_s10 + $0x370] sm:$0xff] }
  0x80   : > { %v461_v48 = vadd.f32 %v460_v37, %v332_v31  ;;  %v544_v54 = vadd.f32 %v543_v44, %v410_v38  ;;  %v346_v5 = vld [vmem:[%s1278_s10 + $0x158] sm:$0xff]  ;;  %v357_v7 = vld [vmem:[%s1278_s10 + $0x1b0] sm:$0xff]  ;;  %v424_v10 = vld [vmem:[%s1278_s10 + $0x3c8] sm:$0xff] }
  0x81   : > { %532 = vadd.xlane.f32.xlu1 %v531_v42  ;;  %v474_v0 = vadd.f32 %v473_v55, %v344_v50  ;;  %v486_v2 = vadd.f32 %v485_v57, %v355_v52  ;;  %v557_v6 = vadd.f32 %v556_v61, %v422_v56  ;;  %v414_v12 = vld [vmem:[%s1278_s10 + $0x378] sm:$0xff]  ;;  %v347_v13 = vld [vmem:[%s1278_s10 + $0x160] sm:$0xff]  ;;  %v425_v18 = vld [vmem:[%s1278_s10 + $0x3d0] sm:$0xff] }
  0x82   : > { %v462_v58 = vadd.f32 %v461_v48, %v333_v43  ;;  %v545_v63 = vadd.f32 %v544_v54, %v411_v49  ;;  %v358_v15 = vld [vmem:[%s1278_s10 + $0x1b8] sm:$0xff]  ;;  %v348_v20 = vld [vmem:[%s1278_s10 + $0x168] sm:$0xff]  ;;  %v359_v22 = vld [vmem:[%s1278_s10 + $0x1c0] sm:$0xff] }
  0x83   : > { %v475_v9 = vadd.f32 %v474_v0, %v345_v60  ;;  %v487_v11 = vadd.f32 %v486_v2, %v356_v62  ;;  %v558_v14 = vadd.f32 %v557_v6, %v423_v1  ;;  %v426_v25 = vld [vmem:[%s1278_s10 + $0x3d8] sm:$0xff]  ;;  %v349_v27 = vld [vmem:[%s1278_s10 + $0x170] sm:$0xff]  ;;  %v360_v29 = vld [vmem:[%s1278_s10 + $0x1c8] sm:$0xff] }
  0x84   : > { %v463_v3 = vadd.f32 %v462_v58, %v334_v53  ;;  %v546_v8 = vadd.f32 %v545_v63, %v412_v59  ;;  %v427_v31 = vld [vmem:[%s1278_s10 + $0x3e0] sm:$0xff]  ;;  %v350_v33 = vld [vmem:[%s1278_s10 + $0x178] sm:$0xff]  ;;  %v361_v35 = vld [vmem:[%s1278_s10 + $0x1d0] sm:$0xff]  ;;  %v576_v58 = vlaneseq }
  0x85   : > { %v476_v17 = vadd.f32 %v475_v9, %v346_v5  ;;  %v488_v19 = vadd.f32 %v487_v11, %v357_v7  ;;  %v559_v21 = vadd.f32 %v558_v14, %v424_v10  ;;  %v428_v37 = vld [vmem:[%s1278_s10 + $0x3e8] sm:$0xff]  ;;  %v362_v40 = vld [vmem:[%s1278_s10 + $0x1d8] sm:$0xff]  ;;  %v429_v42 = vld [vmem:[%s1278_s10 + $0x3f0] sm:$0xff] }
  0x86   : > { %464 = vadd.xlane.f32.xlu0 %v463_v3  ;;  %v547_v16 = vadd.f32 %v546_v8, %v413_v4  ;;  %v363_v45 = vld [vmem:[%s1278_s10 + $0x1e0] sm:$0xff]  ;;  %v430_v46 = vld [vmem:[%s1278_s10 + $0x3f8] sm:$0xff]  ;;  %v364_v49 = vld [vmem:[%s1278_s10 + $0x1e8] sm:$0xff]  ;;  %v577_v61 = vand.u32 127, %v576_v58  ;;  %v579_v1 = vshrl.u32 %v576_v58, 7 }
  0x87   : > { %v477_v24 = vadd.f32 %v476_v17, %v347_v13  ;;  %v489_v26 = vadd.f32 %v488_v19, %v358_v15  ;;  %v560_v28 = vadd.f32 %v559_v21, %v425_v18  ;;  %v365_v52 = vld [vmem:[%s1278_s10 + $0x1f0] sm:$0xff]  ;;  %v366_v54 = vld [vmem:[%s1278_s10 + $0x1f8] sm:$0xff] }
  0x88   : > { %v548_v23 = vadd.f32 %v547_v16, %v414_v12  ;;  %v582_v62 = vadd.s32 4294967288, %v577_v61  ;;  %v589_v0 = vadd.s32 4294967280, %v577_v61  ;;  %v596_v3 = vadd.s32 4294967272, %v577_v61 }
  0x89   : > { %v478_v30 = vadd.f32 %v477_v24, %v348_v20  ;;  %v490_v32 = vadd.f32 %v489_v26, %v359_v22  ;;  %v561_v34 = vadd.f32 %v560_v28, %v426_v25  ;;  %v580_v6 = vsub.s32 %v577_v61, %v579_v1  ;;  %v431_v24 = vld [vmem:[#allocation2] sm:$0x3]  ;;  %v650_v28 = vld [vmem:[#allocation6] sm:$0xff] (!%p840_p5) }
  0x8a   : > { %549 = vadd.xlane.f32.xlu1 %v548_v23  ;;  %v585_v4 = vsub.s32 %v582_v62, %v579_v1  ;;  %v592_v5 = vsub.s32 %v589_v0, %v579_v1  ;;  %v599_v7 = vsub.s32 %v596_v3, %v579_v1 }
  0x8b   : > { %v479_v36 = vadd.f32 %v478_v30, %v349_v27  ;;  %v491_v38 = vadd.f32 %v490_v32, %v360_v29  ;;  %v562_v39 = vadd.f32 %v561_v34, %v427_v31  ;;  %v651_v29 = vld [vmem:[#allocation6 + $0x8] sm:$0xff] (!%p840_p5)  ;;  %v652_v30 = vld [vmem:[#allocation6 + $0x10] sm:$0xff] (!%p840_p5)  ;;  %v1105_v31 = vmov (!%p840_p5), 0.0|0.0  }
  0x8c   : > { %867 = vmatprep.subr.bf16.mxu0 (!%p840_p5), %v1105_v31  ;;  %v868_v32 = vpack.c.bf16 (!%p840_p5), %v651_v29, %v650_v28  ;;  %v1107_v34 = vmov (!%p840_p5), 0.0  }
  0x8d   : > { %v480_v41 = vadd.f32 %v479_v36, %v350_v33  ;;  %v492_v43 = vadd.f32 %v491_v38, %v361_v35  ;;  %v563_v44 = vadd.f32 %v562_v39, %v428_v37  ;;  %v653_v33 = vld [vmem:[#allocation6 + $0x18] sm:$0xff] (!%p840_p5)  ;;  %864 = vmatprep.mubr.msk.f32.mxu0 (!%p840_p5), %vm1106_vm6, %v1107_v34 }
  0x8e   : > { %v841_v36 = vld [vmem:[%s1478_s2] ss:$0 sm:$0xff] (!%p840_p5)  ;;  %869 = vmatpush3.bf16.msra.mxu0 (!%p840_p5), %v868_v32  ;;  %v871_v38 = vpack.c.bf16 (!%p840_p5), %v653_v33, %v652_v30 }
  0x8f   : > { %481 = vadd.xlane.f32.xlu0 %v480_v41  ;;  %v493_v47 = vadd.f32 %v492_v43, %v362_v40  ;;  %v564_v48 = vadd.f32 %v563_v44, %v429_v42  ;;  %v842_v39 = vld [vmem:[%s1479_s3] ss:$0 sm:$0xff] (!%p840_p5)  ;;  %870 = vmatprep.subr.bf16.mxu0 (!%p840_p5), %v1105_v31 }
  0x90   : > { %v844_v42 = vld [vmem:[%s1480_s4] ss:$0 sm:$0xff] (!%p840_p5) }
  0x91   : > { %v494_v50 = vadd.f32 %v493_v47, %v363_v45  ;;  %v565_v51 = vadd.f32 %v564_v48, %v430_v46  ;;  %v845_v44 = vld [vmem:[%s1481_s5] ss:$0 sm:$0xff] (!%p840_p5) }
  0x92   : > { %872 = vmatpush3.bf16.msra.mxu0 (!%p840_p5), %v871_v38 }
  0x93   : > { %v495_v53 = vadd.f32 %v494_v50, %v364_v49  ;;  %566 = vadd.xlane.f32.xlu1 %v565_v51 }
  0x95   : > { %v496_v55 = vadd.f32 %v495_v53, %v365_v52 }
  0x97   : > { %v497_v56 = vadd.f32 %v496_v55, %v366_v54 }
  0x99   : > { %498 = vadd.xlane.f32.xlu0 %v497_v56 }
 0x109   : > { %v516_v57 = vpop.xlane.xlu1 %515 }
 0x10a   : > { %v606_v12 = vrot.slane %v516_v57, %v580_v6 }
 0x10b   : > { %v448_v59 = vpop.xlane.xlu0 %447 }
 0x10c   : > { %v581_v16 = vrot.slane %v448_v59, %v580_v6 }
 0x10e   : > { %v533_v60 = vpop.xlane.xlu1 %532 }
 0x10f   : > { %v610_v9 = vrot.slane %v533_v60, %v585_v4 }
 0x111   : > { %v611_v17 = vsel %vm587_vm1, %v610_v9, %v606_v12 }
 0x113   : > { %v465_v63 = vpop.xlane.xlu0 %464 }
 0x114   : > { %v586_v13 = vrot.slane %v465_v63, %v585_v4 }
 0x116   : > { %v588_v20 = vsel %vm587_vm1, %v586_v13, %v581_v16 }
 0x117   : > { %v550_v2 = vpop.xlane.xlu1 %549 }
 0x118   : > { %v615_v11 = vrot.slane %v550_v2, %v592_v5 }
 0x11a   : > { %v616_v18 = vsel %vm594_vm2, %v615_v11, %v611_v17 }
 0x11c   : > { %v482_v8 = vpop.xlane.xlu0 %481 }
 0x11d   : > { %v593_v15 = vrot.slane %v482_v8, %v592_v5 }
 0x11f   : > { %v595_v23 = vsel %vm594_vm2, %v593_v15, %v588_v20 }
 0x120   : > { %v567_v10 = vpop.xlane.xlu1 %566 }
 0x121   : > { %v620_v14 = vrot.slane %v567_v10, %v599_v7 }
 0x123   : > { %v621_v21 = vsel %vm601_vm3, %v620_v14, %v616_v18 }
 0x126   : > { %v499_v19 = vpop.xlane.xlu0 %498 }
 0x127   : > { %v600_v22 = vrot.slane %v499_v19, %v599_v7  ;;  %631 = sbr.rel (%p840_p5) target bundleno = 532 (0x214), region = 60 }
 0x129   : > { %v602_v25 = vsel %vm601_vm3, %v600_v22, %v595_v23 }
 0x12a   : > { %v623_v26 = vsel %vm622_vm4, %v621_v21, %v602_v25 }
 0x12b   : > { %v625_v27 = vadd.f32 %v623_v26, %v431_v24 }
 0x12d   : > { %627 = vst.msk [vmem:[#allocation2] sm:$0x3] %vm626_vm5, %v625_v27 }
 0x134   : > { %v632_v35 = vld [vmem:[#allocation2] sm:$0x3] }
 0x135   : > { %v633_v37 = vmul.f32 0.00024414063, %v632_v35 }
 0x137   : > { %v641_v40 = vmul.f32 %v841_v36, %v633_v37 }
 0x139   : > { %v649_v41 = vadd.f32 %v842_v39, %v641_v40 }
 0x13b   : > { %865 = vmatmul.mubr.msk.f32.vlgmr.msra.gmra.mrb[0].mxu0 %vm654_vm7, %v649_v41 }
 0x20e   : > { %v724_v43 = vpop.f32.mrb[0].mxu0 }
 0x20f   : > { %v735_v45 = vmul.f32 %v844_v42, %v724_v43  ;;  %v866_v46 = vpop.f32.mrb[1].mxu0 }
 0x211   : > { %v743_v47 = vadd.f32 %v845_v44, %v735_v45 }
 0x213   : > { %745 = vst.msk [vmem:[#allocation8] sm:$0x3] %vm744_vm8, %v743_v47 }
 0x214 PF: > { %s1498_s12 = sadd.s32 4294967295, %s1096_s26   ;;  %s1108_s8 = smov [#allocation8]  }
 0x215   : > { %p1432_p6 = scmp.eq.s32.totalorder %s1498_s12, 1  ;;  %s755_s16 = sshll.u32 %s1108_s8, 4  ;;  %s756_s16 = int_to_ptr.vmem [resolvable:$true] %s755_s16 }
 0x216   : > { %s1012_s27 = scalar_lea.vmem %s756_s16, 32  ;;  %p1019_p7 = scmp.lt.s32.totalorder %s756_s16, %s756_s16 }
 0x217   : > { %p1013_p9 = scmp.ne.s32.totalorder %s756_s16, %s1012_s27  ;;  %p1020_p8 = scmp.lt.s32.totalorder %s1012_s27, %s1012_s27 }
 0x219   : > { %p1014_p11 = pnand %p1013_p9, %p1432_p6  ;;  %p1021_p13 = por %p1020_p8, %p1019_p7 }
 0x21b   : > { %p1015_p3 = pneg %p1014_p11 }
 0x21d   : > { %p1022_p1 = pnand %p1021_p13, %p1015_p3 }
 0x21f   : > { %1025 = shalt.err (!%p1022_p1)
}
 0x220   : > { %s1026_s18 = scalar_lea.hbm %s1482_s6, 32 }
 0x221   : > { %p1027_p2 = scmp.ne.s32.totalorder %s1482_s6, %s1026_s18  ;;  %p1032_p4 = scmp.lt.u32.totalorder %s1026_s18, %s1482_s6 }
 0x223   : > { %p1028_p12 = pnand %p1027_p2, %p1432_p6 }
 0x225   : > { %p1029_p0 = pneg %p1028_p12 }
 0x227   : > { %p1034_p10 = pnand %p1032_p4, %p1029_p0 }
 0x229   : > { %1037 = shalt.err (!%p1034_p10)
}
 0x22a   : > { %880 = dma.vmem_to_hbm [thread:$0]  (%p1432_p6), %s756_s16, 32, %s1482_s6, [#allocation5]  }
 0x22b   : > { %1071 = dma.done.wait (%p1432_p6), [#allocation5], 32  }
 0x22c   : > { %1073 = vsyncadd (%p1432_p6), [#allocation5], 4294967264 }
 0x22d PF: > { %s21_s26 = sadd.s32 1, %s1096_s26   ;;  %s1500_s21 = smov %s1080_s22 }
 0x22e   : > { %p18_p5 = scmp.ge.s32.totalorder %s21_s26, 4   ;;  %s1501_s22 = smov %s1084_s23 }
 0x22f   : > { %s1502_s23 = smov %s1244_s7  ;;  %s1503_s24 = smov %s1092_s25 }
 0x230   : > { %s1504_s25 = smov %s1506_s13  ;;  %20 = sbr.rel (!%p18_p5) target bundleno = 6 (0x6), region = 94 }
 0x237   :  { %768 = vsyncpa [#allocation4], 1 }
 0x238   :  { %770 = vsyncpa [#allocation4 + $0x1], 1 }
 0x239   :  { %771 = vsyncpa [#allocation7], 1 }
 0x23a   :  { %772 = vsyncpa [#allocation5], 1 }
 0x23b   :  { %774 = vsyncpa [#allocation5 + $0x1], 1 }

</bundles_post_ra>
